<compile_context>
chip_gen: v7x
topology: tpu7x:2x2x1
jax: 0.10.0
libtpu: 0.0.40
codegen_flags: <defaults>
</compile_context>

<pallas_src>
import functools

import numpy as np
import jax
import jax.numpy as jnp
from jax.experimental import pallas as pl
from jax.experimental.pallas import tpu as pltpu


def _pick_row_tile(nm):
    """Row-tile TQ: full rows for small NM, else the largest aligned divisor
    <= 256 (keeps the live (TQ, NM) f32 similarity block comfortably inside
    v7x's 64 MiB VMEM while still amortizing per-grid-step overhead)."""
    if nm <= 256:
        return nm
    for t in (256, 128, 64, 32, 16, 8):
        if nm % t == 0:
            return t
    return nm  # ragged NM: fall back to one full-row tile


def _maybe_check_grouping(sampled_neg_inds, B, NM, num_negs):
    """Eagerly validate the (batch, row) grouping assumption when the index
    array is concrete; silently skip under tracing (jit)."""
    try:
        inds = np.asarray(sampled_neg_inds)
    except Exception:
        return
    b_expect = np.repeat(np.arange(B), NM * num_negs)
    r_expect = np.tile(np.repeat(np.arange(NM), num_negs), B)
    if not (np.array_equal(inds[:, 0], b_expect)
            and np.array_equal(inds[:, 1], r_expect)):
        # TODO(synk): arbitrary (b, row, col) triples would need an unfused
        # gather path; the fused kernel assumes row-major (batch, chunk) grouping.
        raise ValueError(
            "sampled_neg_inds must be grouped row-major per (batch, chunk): "
            "inds[:, 0] == batch index, inds[:, 1] == chunk index.")


# ----------------------------------------------------------------------------
# Fused kernel: similarity matmul + gathered-negative exp + masked loss
#               partial sums per batch.
# ----------------------------------------------------------------------------
def _fused_kernel(inv_t, num_negs, tq_const,
                  x_ref, yt_ref, cols_ref, valid_ref, pad_ref,
                  part_ref, acc_ref):
    # x_ref    : (TQ, D)         self rows of this tile (f32 or bf16)
    # yt_ref   : (D, NM)         all cross rows of this batch, pre-transposed
    # cols_ref : (TQ, num_negs)  int32 sampled negative column indices
    # valid_ref: (TQ, num_negs)  f32 0/1 validity of each sampled column
    # pad_ref  : (TQ, 1)         f32 1.0 where the chunk is padding
    # part_ref : (8, 128)        f32 per-batch partial sums (lanes 0..2)
    # acc_ref  : (8, 128)        f32 VMEM accumulator, reset at qi == 0
    qi = pl.program_id(1)

    @pl.when(qi == 0)
    def _init():
        acc_ref[...] = jnp.zeros_like(acc_ref)

    x = x_ref[...]                                       # (TQ, D)
    yt = yt_ref[...]                                     # (D, NM) resident

    # Similarity row-block on the MXU; yt already has NM on the lane axis.
    s = jnp.dot(x, yt, preferred_element_type=jnp.float32)   # (TQ, NM) f32

    tq, nm = s.shape
    col_iota = jax.lax.broadcasted_iota(jnp.int32, (tq, nm), 1)

    # Positive pair <self_r, cross_r> is the diagonal of this row tile: pull
    # it from the already-computed similarity block with a one-hot row-reduce
    # (XLU) instead of DMA-ing a duplicate (TQ, D) y-row stream.
    row_ids = jax.lax.broadcasted_iota(jnp.int32, (tq, 1), 0) + qi * tq_const
    num = jnp.sum(jnp.where(col_iota == row_ids, s, 0.0),
                  axis=-1, keepdims=True)                # (TQ, 1)

    # Sampled negatives: gather logits first (masked row-reduce per column),
    # exponentiate only the gathered (TQ, 1) vectors (TQ*num_negs
    # transcendentals instead of TQ*NM), apply the validity of the sampled
    # column AFTER the exp so invalid columns contribute exactly 0 (no inf*0).
    cols = cols_ref[...]                                 # (TQ, num_negs) int32
    valid = valid_ref[...]                               # (TQ, num_negs) f32
    den = jnp.zeros((tq, 1), jnp.float32)
    for j in range(num_negs):                            # small static unroll
        hit = col_iota == cols[:, j:j + 1]
        s_j = jnp.sum(jnp.where(hit, s, 0.0), axis=-1, keepdims=True)
        den = den + jnp.exp(s_j * inv_t) * valid[:, j:j + 1]

    keep = 1.0 - pad_ref[...]                            # (TQ, 1)
    z = num * inv_t
    # log(exp(z) / (exp(z) + den)) == z - log(exp(z) + den)
    log_exp = z - jnp.log(jnp.exp(z) + den)

    # where (not multiply-by-keep): padded-row inf/NaN cannot leak into sums.
    is_keep = keep > 0.0
    sum_log = jnp.sum(jnp.where(is_keep, log_exp, 0.0))
    sum_sim = jnp.sum(jnp.where(is_keep, 1.0 - num, 0.0))
    sum_keep = jnp.sum(keep)

    lane = jax.lax.broadcasted_iota(jnp.int32, (8, 128), 1)
    contrib = jnp.where(lane == 0, sum_log,
              jnp.where(lane == 1, sum_sim,
              jnp.where(lane == 2, sum_keep, 0.0)))
    acc_ref[...] += contrib

    @pl.when(qi == pl.num_programs(1) - 1)
    def _finish():
        part_ref[...] = acc_ref[...]


# ----------------------------------------------------------------------------
# Wrapper (reshapes, transpose, sampled-column mask gather, final reduction)
# ----------------------------------------------------------------------------
def contrast_across_segments(self_attd_chunk, cross_attd_chunk, padding_mask,
                             valid_negs_mask, sampled_neg_inds,
                             temperature=1.0, use_bf16_matmul=False):
    B, N, M, D = self_attd_chunk.shape
    NM = N * M

    total_inds = sampled_neg_inds.shape[0]
    num_negs = total_inds // (B * NM)
    assert num_negs >= 1 and total_inds == B * NM * num_negs, (
        "sampled_neg_inds must contain B*N*M*num_negs rows")
    _maybe_check_grouping(sampled_neg_inds, B, NM, num_negs)

    compute_dtype = jnp.bfloat16 if use_bf16_matmul else jnp.float32

    x = self_attd_chunk.reshape(B, NM, D).astype(compute_dtype)
    # Transpose once in the wrapper so the MXU RHS block is (D, NM) with NM
    # lane-dense; this block is constant across the inner grid axis and stays
    # resident in VMEM.
    y_t = jnp.transpose(
        cross_attd_chunk.reshape(B, NM, D).astype(compute_dtype), (0, 2, 1))

    cols = sampled_neg_inds[:, 2].reshape(B, NM, num_negs).astype(jnp.int32)
    # Gather validity only at the sampled columns so the kernel never streams
    # the full (B, NM, NM) mask from HBM.
    valid_sel = jnp.take_along_axis(valid_negs_mask, cols,
                                    axis=-1).astype(jnp.float32)

    # padding_mask[:, :, :, 0] in the torch code -> per-chunk padding flags.
    pad = padding_mask[:, :, :, 0].reshape(B, NM, 1).astype(jnp.float32)

    TQ = _pick_row_tile(NM)
    n_qt = NM // TQ
    inv_t = 1.0 / float(temperature)

    kernel = functools.partial(_fused_kernel, inv_t, num_negs, TQ)

    parts = pl.pallas_call(
        kernel,
        out_shape=jax.ShapeDtypeStruct((B, 8, 128), jnp.float32),
        grid_spec=pltpu.PrefetchScalarGridSpec(
            num_scalar_prefetch=0,
            grid=(B, n_qt),
            in_specs=[
                pl.BlockSpec((None, TQ, D), lambda b, q: (b, q, 0)),         # x rows
                pl.BlockSpec((None, D, NM), lambda b, q: (b, 0, 0)),         # y^T (resident)
                pl.BlockSpec((None, TQ, num_negs), lambda b, q: (b, q, 0)),  # sampled cols
                pl.BlockSpec((None, TQ, num_negs), lambda b, q: (b, q, 0)),  # validity of cols
                pl.BlockSpec((None, TQ, 1), lambda b, q: (b, q, 0)),         # padding flags
            ],
            out_specs=pl.BlockSpec((None, 8, 128), lambda b, q: (b, 0, 0)),
            scratch_shapes=[pltpu.VMEM((8, 128), jnp.float32)],
        ),
        compiler_params=pltpu.CompilerParams(
            dimension_semantics=("parallel", "arbitrary"),  # batch axis -> v7x megacore
            vmem_limit_bytes=48 * 1024 * 1024),
    )(x, y_t, cols, valid_sel, pad)

    sum_log = jnp.sum(parts[:, 0, 0])
    sum_sim = jnp.sum(parts[:, 0, 1])
    total = jnp.sum(parts[:, 0, 2])
    return -(sum_log / total), sum_sim / total


# ----------------------------------------------------------------------------
# Pure-JAX reference (mirrors the PyTorch forward) for a correctness check.
# ----------------------------------------------------------------------------
def reference(self_attd, cross_attd, padding_mask, valid_negs_mask,
              sampled_neg_inds, temperature=1.0):
    B, N, M, D = self_attd.shape
    NM = N * M
    num = (self_attd * cross_attd).sum(-1)                       # (B, N, M)
    numerator = jnp.exp(num / temperature)
    x = self_attd.reshape(B, NM, D)
    y = cross_attd.reshape(B, NM, D)
    sim = jnp.exp(jnp.einsum('bid,bjd->bij', x, y,
                             precision=jax.lax.Precision.HIGHEST) / temperature)
    sim = jnp.where(valid_negs_mask, sim, 0.0)
    g = sim[sampled_neg_inds[:, 0], sampled_neg_inds[:, 1], sampled_neg_inds[:, 2]]
    den = g.reshape(B, N, M, -1).sum(-1)
    pad = padding_mask[:, :, :, 0]
    keep = ~pad
    total = keep.sum()
    log_exp = jnp.where(pad, 0.0, jnp.log(numerator / (numerator + den))).sum() / total
    sim_loss = jnp.where(pad, 0.0, 1.0 - num).sum() / total
    return -log_exp, sim_loss


if __name__ == "__main__":
    B, N, M, D = 2, 2, 4, 32
    NM = N * M
    num_negs = 3
    temperature = 1.0

    key = jax.random.PRNGKey(0)
    k1, k2, k3 = jax.random.split(key, 3)
    self_attd = jax.random.normal(k1, (B, N, M, D), jnp.float32) * 0.1
    cross_attd = jax.random.normal(k2, (B, N, M, D), jnp.float32) * 0.1

    # padding: last chunk of every group in batch 1 is padding
    pad_row = jnp.zeros((B, N, M), jnp.bool_).at[1, :, M - 1].set(True)
    padding_mask = jnp.broadcast_to(pad_row[..., None], (B, N, M, D))

    # valid negatives: every pair except self
    valid_negs_mask = jnp.broadcast_to(~jnp.eye(NM, dtype=jnp.bool_)[None],
                                       (B, NM, NM))

    # sampled negative indices: for each (batch, chunk) pick num_negs columns
    cols = jax.random.randint(k3, (B, NM, num_negs), 0, NM)
    b_idx = jnp.broadcast_to(jnp.arange(B)[:, None, None], (B, NM, num_negs))
    r_idx = jnp.broadcast_to(jnp.arange(NM)[None, :, None], (B, NM, num_negs))
    sampled_neg_inds = jnp.stack(
        [b_idx.reshape(-1), r_idx.reshape(-1), cols.reshape(-1)],
        axis=-1).astype(jnp.int32)

    neg_log, sim_loss = contrast_across_segments(
        self_attd, cross_attd, padding_mask, valid_negs_mask,
        sampled_neg_inds, temperature)
    jax.block_until_ready((neg_log, sim_loss))

    ref_neg_log, ref_sim_loss = reference(
        self_attd, cross_attd, padding_mask, valid_negs_mask,
        sampled_neg_inds, temperature)

    np.testing.assert_allclose(np.asarray(neg_log), np.asarray(ref_neg_log),
                               rtol=2e-4, atol=2e-4)
    np.testing.assert_allclose(np.asarray(sim_loss), np.asarray(ref_sim_loss),
                               rtol=2e-4, atol=2e-4)
    print("KERNEL_OK")
</pallas_src>

<mosaic_0001>
module attributes {stable_mosaic.version = 11 : i64} {
  func.func @_fused_kernel(%arg0: i32, %arg1: i32, %arg2: memref<1x8x32xf32, #tpu.memory_space<vmem>>, %arg3: memref<1x32x8xf32, #tpu.memory_space<vmem>>, %arg4: memref<1x8x3xi32, #tpu.memory_space<vmem>>, %arg5: memref<1x8x3xf32, #tpu.memory_space<vmem>>, %arg6: memref<1x8x1xf32, #tpu.memory_space<vmem>>, %arg7: memref<1x8x128xf32, #tpu.memory_space<vmem>>, %arg8: memref<8x128xf32, #tpu.memory_space<vmem>>) attributes {dimension_semantics = [#tpu.dimension_semantics<parallel>, #tpu.dimension_semantics<arbitrary>], iteration_bounds = array<i64: 2, 1>, scalar_prefetch = 0 : i64, scratch_operands = 1 : i64, tpu.core_type = #tpu.core_type<tc>, window_params = [{transform_indices = @transform_0, window_bounds = array<i64: 1, 8, 32>}, {transform_indices = @transform_1, window_bounds = array<i64: 1, 32, 8>}, {transform_indices = @transform_2, window_bounds = array<i64: 1, 8, 3>}, {transform_indices = @transform_3, window_bounds = array<i64: 1, 8, 3>}, {transform_indices = @transform_4, window_bounds = array<i64: 1, 8, 1>}, {transform_indices = @transform_5, window_bounds = array<i64: 1, 8, 128>}]} {
    %c0_i32 = arith.constant 0 : i32
    %0 = arith.cmpi eq, %arg1, %c0_i32 : i32
    %1 = arith.extui %0 : i1 to i32
    %c0_i32_0 = arith.constant 0 : i32
    %2 = arith.cmpi ne, %1, %c0_i32_0 : i32
    scf.if %2 {
      %cst_44 = arith.constant 0.000000e+00 : f32
      %113 = vector.broadcast %cst_44 : f32 to vector<8x128xf32>
      %c0_45 = arith.constant 0 : index
      %c0_46 = arith.constant 0 : index
      %114 = vector.load %arg8[%c0_45, %c0_46] : memref<8x128xf32, #tpu.memory_space<vmem>>, vector<8x128xf32>
      tpu.vector_store %arg8[%c0_45, %c0_46], %113 {strides = array<i32>} : memref<8x128xf32, #tpu.memory_space<vmem>>, vector<8x128xf32>,
    } else {
    }
    %c0 = arith.constant 0 : index
    %c0_1 = arith.constant 0 : index
    %c0_2 = arith.constant 0 : index
    %3 = vector.load %arg2[%c0, %c0_1, %c0_2] : memref<1x8x32xf32, #tpu.memory_space<vmem>>, vector<1x8x32xf32>
    %4 = vector.shape_cast %3 : vector<1x8x32xf32> to vector<8x32xf32>
    %c0_3 = arith.constant 0 : index
    %c0_4 = arith.constant 0 : index
    %c0_5 = arith.constant 0 : index
    %5 = vector.load %arg3[%c0_3, %c0_4, %c0_5] : memref<1x32x8xf32, #tpu.memory_space<vmem>>, vector<1x32x8xf32>
    %6 = vector.shape_cast %5 : vector<1x32x8xf32> to vector<32x8xf32>
    %cst = arith.constant dense<0.000000e+00> : vector<8x8xf32>
    %7 = tpu.matmul %4, %6, %cst {dimension_numbers = #tpu.dot_dimension_numbers<[1], [0], [0], [1], [0, 0, 1, 1], [], []>} : vector<8x32xf32>, vector<32x8xf32>, vector<8x8xf32> -> vector<8x8xf32>
    %8 = tpu.iota {dimensions = array<i32: 1>} : vector<8x8xi32>
    %9 = tpu.iota {dimensions = array<i32: 0>} : vector<8x1xi32>
    %c8_i32 = arith.constant 8 : i32
    %10 = arith.muli %arg1, %c8_i32 : i32
    %11 = vector.broadcast %10 : i32 to vector<8x1xi32>
    %12 = arith.addi %9, %11 : vector<8x1xi32>
    %13 = vector.broadcast %12 : vector<8x1xi32> to vector<8x8xi32>
    %14 = arith.cmpi eq, %8, %13 : vector<8x8xi32>
    %cst_6 = arith.constant 0.000000e+00 : f32
    %15 = vector.broadcast %cst_6 : f32 to vector<8x8xf32>
    %16 = arith.select %14, %7, %15 : vector<8x8xi1>, vector<8x8xf32>
    %cst_7 = arith.constant dense<0.000000e+00> : vector<8xf32>
    %17 = vector.multi_reduction <add>, %16, %cst_7 [1] : vector<8x8xf32> to vector<8xf32>
    %18 = vector.shape_cast %17 : vector<8xf32> to vector<8x1xf32>
    %c0_8 = arith.constant 0 : index
    %c0_9 = arith.constant 0 : index
    %c0_10 = arith.constant 0 : index
    %19 = vector.load %arg4[%c0_8, %c0_9, %c0_10] : memref<1x8x3xi32, #tpu.memory_space<vmem>>, vector<1x8x3xi32>
    %20 = vector.shape_cast %19 : vector<1x8x3xi32> to vector<8x3xi32>
    %c0_11 = arith.constant 0 : index
    %c0_12 = arith.constant 0 : index
    %c0_13 = arith.constant 0 : index
    %21 = vector.load %arg5[%c0_11, %c0_12, %c0_13] : memref<1x8x3xf32, #tpu.memory_space<vmem>>, vector<1x8x3xf32>
    %22 = vector.shape_cast %21 : vector<1x8x3xf32> to vector<8x3xf32>
    %cst_14 = arith.constant 0.000000e+00 : f32
    %23 = vector.broadcast %cst_14 : f32 to vector<8x1xf32>
    %24 = vector.extract_strided_slice %20 {offsets = [0, 0], sizes = [8, 1], strides = [1, 1]} : vector<8x3xi32> to vector<8x1xi32>
    %25 = vector.broadcast %24 : vector<8x1xi32> to vector<8x8xi32>
    %26 = arith.cmpi eq, %8, %25 : vector<8x8xi32>
    %cst_15 = arith.constant 0.000000e+00 : f32
    %27 = vector.broadcast %cst_15 : f32 to vector<8x8xf32>
    %28 = arith.select %26, %7, %27 : vector<8x8xi1>, vector<8x8xf32>
    %cst_16 = arith.constant dense<0.000000e+00> : vector<8xf32>
    %29 = vector.multi_reduction <add>, %28, %cst_16 [1] : vector<8x8xf32> to vector<8xf32>
    %30 = vector.shape_cast %29 : vector<8xf32> to vector<8x1xf32>
    %cst_17 = arith.constant 1.000000e+00 : f32
    %31 = vector.broadcast %cst_17 : f32 to vector<8x1xf32>
    %32 = arith.mulf %30, %31 : vector<8x1xf32>
    %33 = math.exp %32 : vector<8x1xf32>
    %34 = vector.extract_strided_slice %22 {offsets = [0, 0], sizes = [8, 1], strides = [1, 1]} : vector<8x3xf32> to vector<8x1xf32>
    %35 = arith.mulf %33, %34 : vector<8x1xf32>
    %36 = arith.addf %23, %35 : vector<8x1xf32>
    %37 = vector.extract_strided_slice %20 {offsets = [0, 1], sizes = [8, 1], strides = [1, 1]} : vector<8x3xi32> to vector<8x1xi32>
    %38 = vector.broadcast %37 : vector<8x1xi32> to vector<8x8xi32>
    %39 = arith.cmpi eq, %8, %38 : vector<8x8xi32>
    %cst_18 = arith.constant 0.000000e+00 : f32
    %40 = vector.broadcast %cst_18 : f32 to vector<8x8xf32>
    %41 = arith.select %39, %7, %40 : vector<8x8xi1>, vector<8x8xf32>
    %cst_19 = arith.constant dense<0.000000e+00> : vector<8xf32>
    %42 = vector.multi_reduction <add>, %41, %cst_19 [1] : vector<8x8xf32> to vector<8xf32>
    %43 = vector.shape_cast %42 : vector<8xf32> to vector<8x1xf32>
    %cst_20 = arith.constant 1.000000e+00 : f32
    %44 = vector.broadcast %cst_20 : f32 to vector<8x1xf32>
    %45 = arith.mulf %43, %44 : vector<8x1xf32>
    %46 = math.exp %45 : vector<8x1xf32>
    %47 = vector.extract_strided_slice %22 {offsets = [0, 1], sizes = [8, 1], strides = [1, 1]} : vector<8x3xf32> to vector<8x1xf32>
    %48 = arith.mulf %46, %47 : vector<8x1xf32>
    %49 = arith.addf %36, %48 : vector<8x1xf32>
    %50 = vector.extract_strided_slice %20 {offsets = [0, 2], sizes = [8, 1], strides = [1, 1]} : vector<8x3xi32> to vector<8x1xi32>
    %51 = vector.broadcast %50 : vector<8x1xi32> to vector<8x8xi32>
    %52 = arith.cmpi eq, %8, %51 : vector<8x8xi32>
    %cst_21 = arith.constant 0.000000e+00 : f32
    %53 = vector.broadcast %cst_21 : f32 to vector<8x8xf32>
    %54 = arith.select %52, %7, %53 : vector<8x8xi1>, vector<8x8xf32>
    %cst_22 = arith.constant dense<0.000000e+00> : vector<8xf32>
    %55 = vector.multi_reduction <add>, %54, %cst_22 [1] : vector<8x8xf32> to vector<8xf32>
    %56 = vector.shape_cast %55 : vector<8xf32> to vector<8x1xf32>
    %cst_23 = arith.constant 1.000000e+00 : f32
    %57 = vector.broadcast %cst_23 : f32 to vector<8x1xf32>
    %58 = arith.mulf %56, %57 : vector<8x1xf32>
    %59 = math.exp %58 : vector<8x1xf32>
    %60 = vector.extract_strided_slice %22 {offsets = [0, 2], sizes = [8, 1], strides = [1, 1]} : vector<8x3xf32> to vector<8x1xf32>
    %61 = arith.mulf %59, %60 : vector<8x1xf32>
    %62 = arith.addf %49, %61 : vector<8x1xf32>
    %c0_24 = arith.constant 0 : index
    %c0_25 = arith.constant 0 : index
    %c0_26 = arith.constant 0 : index
    %63 = vector.load %arg6[%c0_24, %c0_25, %c0_26] : memref<1x8x1xf32, #tpu.memory_space<vmem>>, vector<1x8x1xf32>
    %64 = vector.shape_cast %63 : vector<1x8x1xf32> to vector<8x1xf32>
    %cst_27 = arith.constant 1.000000e+00 : f32
    %65 = vector.broadcast %cst_27 : f32 to vector<8x1xf32>
    %66 = arith.subf %65, %64 : vector<8x1xf32>
    %cst_28 = arith.constant 1.000000e+00 : f32
    %67 = vector.broadcast %cst_28 : f32 to vector<8x1xf32>
    %68 = arith.mulf %18, %67 : vector<8x1xf32>
    %69 = math.exp %68 : vector<8x1xf32>
    %70 = arith.addf %69, %62 : vector<8x1xf32>
    %71 = math.log %70 : vector<8x1xf32>
    %72 = arith.subf %68, %71 : vector<8x1xf32>
    %cst_29 = arith.constant 0.000000e+00 : f32
    %73 = vector.broadcast %cst_29 : f32 to vector<8x1xf32>
    %74 = arith.cmpf ogt, %66, %73 : vector<8x1xf32>
    %cst_30 = arith.constant 0.000000e+00 : f32
    %75 = vector.broadcast %cst_30 : f32 to vector<8x1xf32>
    %76 = arith.select %74, %72, %75 : vector<8x1xi1>, vector<8x1xf32>
    %77 = vector.shape_cast %76 : vector<8x1xf32> to vector<1x8x1xf32>
    %cst_31 = arith.constant dense<0.000000e+00> : vector<1xf32>
    %78 = vector.multi_reduction <add>, %77, %cst_31 [1, 2] : vector<1x8x1xf32> to vector<1xf32>
    %79 = vector.shape_cast %78 : vector<1xf32> to vector<1x1x1xf32>
    %80 = vector.extract %79[0, 0, 0] : f32 from vector<1x1x1xf32>
    %cst_32 = arith.constant 1.000000e+00 : f32
    %81 = vector.broadcast %cst_32 : f32 to vector<8x1xf32>
    %82 = arith.subf %81, %18 : vector<8x1xf32>
    %cst_33 = arith.constant 0.000000e+00 : f32
    %83 = vector.broadcast %cst_33 : f32 to vector<8x1xf32>
    %84 = arith.select %74, %82, %83 : vector<8x1xi1>, vector<8x1xf32>
    %85 = vector.shape_cast %84 : vector<8x1xf32> to vector<1x8x1xf32>
    %cst_34 = arith.constant dense<0.000000e+00> : vector<1xf32>
    %86 = vector.multi_reduction <add>, %85, %cst_34 [1, 2] : vector<1x8x1xf32> to vector<1xf32>
    %87 = vector.shape_cast %86 : vector<1xf32> to vector<1x1x1xf32>
    %88 = vector.extract %87[0, 0, 0] : f32 from vector<1x1x1xf32>
    %89 = vector.shape_cast %66 : vector<8x1xf32> to vector<1x8x1xf32>
    %cst_35 = arith.constant dense<0.000000e+00> : vector<1xf32>
    %90 = vector.multi_reduction <add>, %89, %cst_35 [1, 2] : vector<1x8x1xf32> to vector<1xf32>
    %91 = vector.shape_cast %90 : vector<1xf32> to vector<1x1x1xf32>
    %92 = vector.extract %91[0, 0, 0] : f32 from vector<1x1x1xf32>
    %93 = tpu.iota {dimensions = array<i32: 1>} : vector<8x128xi32>
    %c0_i32_36 = arith.constant 0 : i32
    %94 = vector.broadcast %c0_i32_36 : i32 to vector<8x128xi32>
    %95 = arith.cmpi eq, %93, %94 : vector<8x128xi32>
    %c1_i32 = arith.constant 1 : i32
    %96 = vector.broadcast %c1_i32 : i32 to vector<8x128xi32>
    %97 = arith.cmpi eq, %93, %96 : vector<8x128xi32>
    %c2_i32 = arith.constant 2 : i32
    %98 = vector.broadcast %c2_i32 : i32 to vector<8x128xi32>
    %99 = arith.cmpi eq, %93, %98 : vector<8x128xi32>
    %cst_37 = arith.constant 0.000000e+00 : f32
    %100 = vector.broadcast %92 : f32 to vector<8x128xf32>
    %101 = vector.broadcast %cst_37 : f32 to vector<8x128xf32>
    %102 = arith.select %99, %100, %101 : vector<8x128xi1>, vector<8x128xf32>
    %103 = vector.broadcast %88 : f32 to vector<8x128xf32>
    %104 = arith.select %97, %103, %102 : vector<8x128xi1>, vector<8x128xf32>
    %105 = vector.broadcast %80 : f32 to vector<8x128xf32>
    %106 = arith.select %95, %105, %104 : vector<8x128xi1>, vector<8x128xf32>
    %c0_38 = arith.constant 0 : index
    %c0_39 = arith.constant 0 : index
    %107 = vector.load %arg8[%c0_38, %c0_39] : memref<8x128xf32, #tpu.memory_space<vmem>>, vector<8x128xf32>
    %108 = arith.addf %107, %106 : vector<8x128xf32>
    %c0_40 = arith.constant 0 : index
    %c0_41 = arith.constant 0 : index
    %109 = vector.load %arg8[%c0_40, %c0_41] : memref<8x128xf32, #tpu.memory_space<vmem>>, vector<8x128xf32>
    tpu.vector_store %arg8[%c0_40, %c0_41], %108 {strides = array<i32>} : memref<8x128xf32, #tpu.memory_space<vmem>>, vector<8x128xf32>,
    %c0_i32_42 = arith.constant 0 : i32
    %110 = arith.cmpi eq, %arg1, %c0_i32_42 : i32
    %111 = arith.extui %110 : i1 to i32
    %c0_i32_43 = arith.constant 0 : i32
    %112 = arith.cmpi ne, %111, %c0_i32_43 : i32
    scf.if %112 {
      %c0_44 = arith.constant 0 : index
      %c0_45 = arith.constant 0 : index
      %113 = vector.load %arg8[%c0_44, %c0_45] : memref<8x128xf32, #tpu.memory_space<vmem>>, vector<8x128xf32>
      %c0_46 = arith.constant 0 : index
      %c0_47 = arith.constant 0 : index
      %c0_48 = arith.constant 0 : index
      %114 = vector.load %arg7[%c0_46, %c0_47, %c0_48] : memref<1x8x128xf32, #tpu.memory_space<vmem>>, vector<1x8x128xf32>
      %115 = vector.shape_cast %114 : vector<1x8x128xf32> to vector<8x128xf32>
      %116 = vector.shape_cast %113 : vector<8x128xf32> to vector<1x8x128xf32>
      tpu.vector_store %arg7[%c0_46, %c0_47, %c0_48], %116 {strides = array<i32>} : memref<1x8x128xf32, #tpu.memory_space<vmem>>, vector<1x8x128xf32>,
    } else {
    }
    return
  }
  func.func @transform_0(%arg0: i32, %arg1: i32) -> (i32, i32, i32) {
    %c0_i32 = arith.constant 0 : i32
    %c0_i32_0 = arith.constant 0 : i32
    return %arg0, %arg1, %c0_i32 : i32, i32, i32
  }
  func.func @transform_1(%arg0: i32, %arg1: i32) -> (i32, i32, i32) {
    %c0_i32 = arith.constant 0 : i32
    %c0_i32_0 = arith.constant 0 : i32
    %c0_i32_1 = arith.constant 0 : i32
    return %arg0, %c0_i32, %c0_i32_0 : i32, i32, i32
  }
  func.func @transform_2(%arg0: i32, %arg1: i32) -> (i32, i32, i32) {
    %c0_i32 = arith.constant 0 : i32
    %c0_i32_0 = arith.constant 0 : i32
    return %arg0, %arg1, %c0_i32 : i32, i32, i32
  }
  func.func @transform_3(%arg0: i32, %arg1: i32) -> (i32, i32, i32) {
    %c0_i32 = arith.constant 0 : i32
    %c0_i32_0 = arith.constant 0 : i32
    return %arg0, %arg1, %c0_i32 : i32, i32, i32
  }
  func.func @transform_4(%arg0: i32, %arg1: i32) -> (i32, i32, i32) {
    %c0_i32 = arith.constant 0 : i32
    %c0_i32_0 = arith.constant 0 : i32
    return %arg0, %arg1, %c0_i32 : i32, i32, i32
  }
  func.func @transform_5(%arg0: i32, %arg1: i32) -> (i32, i32, i32) {
    %c0_i32 = arith.constant 0 : i32
    %c0_i32_0 = arith.constant 0 : i32
    %c0_i32_1 = arith.constant 0 : i32
    return %arg0, %c0_i32, %c0_i32_0 : i32, i32, i32
  }
}

</mosaic_0001>

<bundles_post_ra>
// kernel: tpu_custom_call.1
= control target key start
LH: loop header
LB: loop body
LE: loop exit
PB: predicated region body
PF: predicated region fallthrough
CT: control target
= control target key end

     0   :  { %10 = vsyncpa [#allocation4], 0  ;;  %s1082_s0 = inlined_call_operand.vmem [shape: f32[2,8,32], index: 0, kind: input, shape index: {}]   ;;  %s1083_s1 = inlined_call_operand.vmem [shape: f32[2,32,8], index: 1, kind: input, shape index: {}]   ;;  %s1084_s2 = inlined_call_operand.vmem [shape: s32[2,8,3], index: 2, kind: input, shape index: {}]   ;;  %s1085_s3 = inlined_call_operand.vmem [shape: f32[2,8,3], index: 3, kind: input, shape index: {}]   ;;  %s1086_s4 = inlined_call_operand.vmem [shape: f32[2,8,1], index: 4, kind: input, shape index: {}]   ;;  %s1087_s5 = inlined_call_operand.hbm [shape: f32[2,8,128], index: 5, kind: output, shape index: {}]  }
   0x1   :  { %12 = vsyncpa [#allocation4 + $0x1], 0  ;;  %s932_s18 = smov 0   ;;  %s934_s19 = smov 0  }
   0x2   :  { %s936_s20 = smov 0   ;;  %s938_s21 = smov 0  }
   0x3   :  { %s940_s22 = smov 0   ;;  %s942_s23 = smov 0  }
   0x4 LB: > { %s691_s24 = sadd.s32 4294967295, %s891_s23   ;;  %s692_s25 = sadd.s32 4294967294, %s891_s23   ;;  %s891_s23 = sphi %s942_s23, %s18_s23   ;;  %s887_s22 = sphi %s940_s22, %s1096_s22   ;;  %s883_s21 = sphi %s938_s21, %s1095_s21   ;;  %s879_s20 = sphi %s936_s20, %s1094_s20   ;;  %s875_s19 = sphi %s934_s19, %s1093_s19   ;;  %s871_s18 = sphi %s932_s18, %s1092_s18  }
   0x5   : > { %s30_s26 = sadd.s32 1, %s887_s22  ;;  %s175_s27 = sadd.s32 1, %s879_s20 }
   0x6   : > { %p32_p0 = scmp.ge.s32.totalorder %s30_s26, 2  ;;  %p185_p1 = scmp.ne.s32.totalorder %s879_s20, %s875_s19 }
   0x7   : > { %p186_p2 = scmp.eq.s32.totalorder %s691_s24, 1  ;;  %p191_p3 = scmp.ne.s32.totalorder %s875_s19, %s871_s18 }
   0x8   : > { %s1098_s26 = smov (%p32_p0, %s30_s26), 0  ;;  %p192_p5 = scmp.eq.s32.totalorder %s692_s25, 1 }
   0x9   : > { %p972_p4 = por %p186_p2, %p185_p1  ;;  %s172_s29 = ssub.s32 %s887_s22, %s1098_s26 }
   0xa   : > { %p695_p6 = scmp.ge.s32.totalorder %s891_s23, 1  ;;  %p173_p7 = scmp.eq.s32.totalorder %s172_s29, 0 }
   0xb   : > { %p979_p8 = por %p192_p5, %p191_p3  ;;  %p258_p9 = scmp.lt.s32.totalorder %s891_s23, 3 }
   0xc   : > { %s985_s6 = scalar_select %p173_p7, %s879_s20, %s175_s27  }
   0xd   : > { %p259_p10 = pnand %p695_p6, %p258_p9 }
   0xe   : > { %p314_p11 = scmp.lt.s32.totalorder (!%p259_p10), %s883_s21, 1  ;;  %v893_v0 = vmov (!%p259_p10), 0.0|0.0   ;;  %vm894_vm0 = vmmov (!%p259_p10), 0   ;;  %v895_v1 = vmov (!%p259_p10), 0.0   ;;  %v896_v2 = vmov (!%p259_p10), 1   ;;  %s705_s16 = sshll.u32 (!%p259_p10), %s883_s21, 7 }
   0xf   : > { %262 = sbr.rel (%p259_p10) target bundleno = 772 (0x304), region = 40  ;;  %725 = vmatprep.subr.bf16.mxu0 (!%p259_p10), %v893_v0  ;;  %722 = vmatprep.mubr.msk.f32.mxu0 (!%p259_p10), %vm894_vm0, %v895_v1  ;;  %v897_v3 = vmov (!%p259_p10), 0   ;;  %v898_v11 = vmov (!%p259_p10), 2   ;;  %vm357_vm1 = vcmask (!%p259_p10), 261120   ;;  %v431_v14 = vlaneseq (!%p259_p10)  ;;  %s901_s9 = smov (!%p259_p10), [#allocation3]  }
  0x10   : > { %800 = vset.pattern.permute.xlu0 (!%p259_p10), %v896_v2  ;;  %802 = vset.pattern.permute.xlu1 (!%p259_p10), %v897_v3  ;;  %vm440_vm3 = vcmask (!%p259_p10), 64512   ;;  %vm500_vm8 = vcmask (!%p259_p10), 7168   ;;  %s817_s10 = sshll.u32 (!%p259_p10), %s901_s9, 4  ;;  %s818_s10 = int_to_ptr.vmem [resolvable:$false] %s817_s10 }
  0x11   : > { %v1002_v16 = vand.u32 (!%p259_p10), 127, %v431_v14  ;;  %v434_v17 = vshrl.u32 (!%p259_p10), %v431_v14, 7 }
  0x13   : > { %vm438_vm6 = vcmp.eq.s32.totalorder (!%p259_p10), %v1002_v16, %v434_v17  ;;  %vm535_vm9 = vcmp.eq.s32.totalorder (!%p259_p10), %v1002_v16, 2  ;;  %vm534_vm10 = vcmp.eq.s32.totalorder (!%p259_p10), %v1002_v16, 1  ;;  %vm533_vm11 = vcmp.eq.s32.totalorder (!%p259_p10), %v1002_v16, 0 }
  0x16   : > { %s315_s7 = scalar_select %p314_p11, %s883_s21, 1 }
  0x18   : > { %s708_s8 = sshll.u32 %s315_s7, 5  ;;  %s992_s12 = sshll.u32 %s315_s7, 3 }
  0x19   : > { %s325_s11 = scalar_lea.vmem %s1083_s1, %s708_s8  ;;  %s332_s15 = scalar_lea.vmem %s1084_s2, %s992_s12 }
  0x1a   : > { %v353_v4 = vld [vmem:[%s325_s11] sm:$0xff]  ;;  %v354_v5 = vld [vmem:[%s325_s11 + $0x8] sm:$0xff]  ;;  %v355_v6 = vld [vmem:[%s325_s11 + $0x10] sm:$0xff]  ;;  %s320_s24 = scalar_lea.vmem %s1082_s0, %s992_s12  ;;  %s339_s29 = scalar_lea.vmem %s1085_s3, %s992_s12 }
  0x1b   : > { %v726_v7 = vpack.c.bf16 %v354_v5, %v353_v4  ;;  %v356_v8 = vld [vmem:[%s325_s11 + $0x18] sm:$0xff]  ;;  %v444_v9 = vld [vmem:[%s332_s15] sm:$0xff]  ;;  %s899_s7 = smov 126   ;;  %s900_s8 = smov 127  }
  0x1c   : > { %459 = vperm.xlu0 %800, %v444_v9   ;;  %447 = vperm.xlu1 %802, %v444_v9   ;;  %v729_v10 = vpack.c.bf16 %v356_v8, %v355_v6  ;;  %v352_v12 = vld [vmem:[%s320_s24] sm:$0xff]  ;;  %s346_s11 = scalar_lea.vmem %s1086_s4, %s992_s12  ;;  %s311_s12 = sand.u32 1, %s875_s19  }
  0x1d   : > { %727 = vmatpush3.bf16.msra.mxu0 %v726_v7  ;;  %v445_v33 = vld [vmem:[%s339_s29] sm:$0xff]  ;;  %s696_s13 = sshll.u32 %s311_s12, 3  ;;  %s551_s21 = scalar_lea.sflag [#allocation4], %s311_s12 }
  0x1e   : > { %728 = vmatprep.subr.bf16.mxu0 %v893_v0  ;;  %v490_v38 = vld [vmem:[%s346_s11] sm:$0xff]  ;;  %s313_s24 = scalar_lea.vmem [#allocation3], %s696_s13  ;;  %s819_s11 = scalar_lea.vmem %s818_s10, 256 }
  0x1f   : > { %v491_v40 = vsub.f32 1.0, %v490_v38  ;;  %s564_s25 = sshll.u32 %s313_s24, 4  ;;  %s1037_s25 = int_to_ptr.vmem [resolvable:$true] %s564_s25 }
  0x20   : > { %801 = vset.pattern.permute.xlu0 %v898_v11  ;;  %p820_p1 = scmp.lt.s32.totalorder %s1037_s25, %s818_s10 }
  0x21   : > { %730 = vmatpush3.bf16.msra.mxu0 %v729_v10  ;;  %475 = vperm.xlu0 %801, %v444_v9   ;;  %vm1016_vm7 = vcmp.gt.f32.partialorder %v491_v40, 0.0  ;;  %v523_v61 = vsel %vm500_vm8, %v491_v40, 0.0 }
  0x24   : > { %723 = vmatmul.mubr.msk.f32.vlgmr.msra.gmra.mrb[0].mxu0 %vm357_vm1, %v352_v12 }
  0x9b   : > { %v460_v13 = vpop.permute.xlu0 %459  ;;  %v448_v18 = vpop.permute.xlu1 %447 }
  0x9c   : > { %vm461_vm4 = vcmp.eq.s32.totalorder %v1002_v16, %v460_v13  ;;  %vm449_vm5 = vcmp.eq.s32.totalorder %v1002_v16, %v448_v18 }
  0xa0   : > { %v476_v15 = vpop.permute.xlu0 %475 }
  0xa1   : > { %vm477_vm2 = vcmp.eq.s32.totalorder %v1002_v16, %v476_v15 }
  0xf7   : > { %v427_v19 = vpop.f32.mrb[0].mxu0 }
  0xf8   : > { %v724_v20 = vpop.f32.mrb[1].mxu0  ;;  %v478_v21 = vsel %vm477_vm2, %v427_v19, 0.0  ;;  %v462_v22 = vsel %vm461_vm4, %v427_v19, 0.0  ;;  %v450_v25 = vsel %vm449_vm5, %v427_v19, 0.0  ;;  %v439_v26 = vsel %vm438_vm6, %v427_v19, 0.0 }
  0xf9   : > { %v479_v23 = vsel %vm440_vm3, %v478_v21, 0.0  ;;  %v463_v24 = vsel %vm440_vm3, %v462_v22, 0.0  ;;  %v451_v27 = vsel %vm440_vm3, %v450_v25, 0.0  ;;  %v441_v28 = vsel %vm440_vm3, %v439_v26, 0.0 }
  0xfa   : > { %480 = vadd.xlane.f32.xlu0 %v479_v23  ;;  %464 = vadd.xlane.f32.xlu1 %v463_v24 }
  0xfe   : > { %452 = vadd.xlane.f32.xlu1 %v451_v27  ;;  %442 = vadd.xlane.f32.xlu0 %v441_v28 }
 0x187   : > { %v481_v29 = vpop.xlane.xlu0 %480  ;;  %v465_v30 = vpop.xlane.xlu1 %464 }
 0x188   : > { %v482_v31 = vmul.f32 1.442695, %v481_v29  ;;  %v466_v32 = vmul.f32 1.442695, %v465_v30 }
 0x18a   : > { %803 = vpow2.f32 %v482_v31 }
 0x18b   : > { %805 = vpow2.f32 %v466_v32  ;;  %v443_v39 = vpop.xlane.xlu0 %442  ;;  %v453_v45 = vpop.xlane.xlu1 %452 }
 0x18c   : > { %v511_v41 = vsub.f32 1.0, %v443_v39  ;;  %v454_v46 = vmul.f32 1.442695, %v453_v45  ;;  %v492_v47 = vmul.f32 1.442695, %v443_v39 }
 0x18e   : > { %v512_v43 = vsel %vm1016_vm7, %v511_v41, 0.0  ;;  %807 = vpow2.f32 %v454_v46 }
 0x18f   : > { %v513_v44 = vsel %vm500_vm8, %v512_v43, 0.0  ;;  %809 = vpow2.f32 %v492_v47 }
 0x194   : > { %v804_v34 = vpop.eup %803 }
 0x195   : > { %v806_v35 = vpop.eup %805  ;;  %v484_v36 = vmul.f32 %v804_v34, %v445_v33 }
 0x196   : > { %v468_v37 = vmul.f32 %v806_v35, %v445_v33 }
 0x197   : > { %486 = vrot.lane.b32.xlu0 %v484_v36, %s899_s7  ;;  %s1035_s7 = scalar_lea.hbm %s1087_s5, %s705_s16 }
 0x198   : > { %470 = vrot.lane.b32.xlu1 %v468_v37, %s900_s8  ;;  %v808_v48 = vpop.eup %807  ;;  %s813_s8 = scalar_lea.vmem %s1037_s25, 128 }
 0x199   : > { %v456_v49 = vmul.f32 %v808_v48, %v445_v33  ;;  %v810_v54 = vpop.eup %809  ;;  %p814_p12 = scmp.ne.s32.totalorder %s1037_s25, %s813_s8  ;;  %p821_p2 = scmp.lt.s32.totalorder %s819_s11, %s813_s8 }
 0x19b   : > { %p815_p13 = pnand %p814_p12, %p972_p4  ;;  %p822_p3 = por %p821_p2, %p820_p1 }
 0x19d   : > { %p816_p0 = pneg %p815_p13 }
 0x19f   : > { %p823_p5 = pnand %p822_p3, %p816_p0 }
 0x1b6   : > { %514 = vadd.xlane.f32.xlu0 %v513_v44 }
 0x209   : > { %v487_v52 = vpop.permute.xlu0 %486 }
 0x20a   : > { %v471_v50 = vpop.permute.xlu1 %470 }
 0x20b   : > { %v473_v51 = vadd.f32 %v471_v50, %v456_v49 }
 0x20d   : > { %v489_v53 = vadd.f32 %v487_v52, %v473_v51 }
 0x20f   : > { %v494_v55 = vadd.f32 %v810_v54, %v489_v53 }
 0x211   : > { %811 = vlog2.f32 %v494_v55 }
 0x21b   : > { %v812_v56 = vpop.eup %811 }
 0x21c   : > { %v496_v57 = vmul.f32 0.6931472, %v812_v56 }
 0x21e   : > { %v497_v58 = vsub.f32 %v443_v39, %v496_v57 }
 0x220   : > { %v499_v59 = vsel %vm1016_vm7, %v497_v58, 0.0 }
 0x221   : > { %v501_v60 = vsel %vm500_vm8, %v499_v59, 0.0 }
 0x222   : > { %502 = vadd.xlane.f32.xlu1 %v501_v60 }
 0x226   : > { %524 = vadd.xlane.f32.xlu1 %v523_v61 }
 0x243   : > { %v515_v62 = vpop.xlane.xlu0 %514 }
 0x244   : > { %v516_v63 = vrot.slane %v515_v62, 4 }
 0x246   : > { %v517_v0 = vadd.f32 %v516_v63, %v515_v62 }
 0x248   : > { %v518_v1 = vrot.slane %v517_v0, 2 }
 0x24a   : > { %v519_v5 = vadd.f32 %v518_v1, %v517_v0 }
 0x24c   : > { %v520_v11 = vrot.slane %v519_v5, 1 }
 0x24e   : > { %v521_v17 = vadd.f32 %v520_v11, %v519_v5 }
 0x2af   : > { %v503_v2 = vpop.xlane.xlu1 %502 }
 0x2b0   : > { %v504_v3 = vrot.slane %v503_v2, 4 }
 0x2b2   : > { %v505_v4 = vadd.f32 %v504_v3, %v503_v2 }
 0x2b3   : > { %v525_v6 = vpop.xlane.xlu1 %524 }
 0x2b4   : > { %v506_v7 = vrot.slane %v505_v4, 2  ;;  %v526_v8 = vrot.slane %v525_v6, 4 }
 0x2b6   : > { %v527_v9 = vadd.f32 %v526_v8, %v525_v6  ;;  %v507_v10 = vadd.f32 %v506_v7, %v505_v4 }
 0x2b8   : > { %v528_v12 = vrot.slane %v527_v9, 2  ;;  %v508_v13 = vrot.slane %v507_v10, 1 }
 0x2ba   : > { %v529_v14 = vadd.f32 %v528_v12, %v527_v9  ;;  %v509_v15 = vadd.f32 %v508_v13, %v507_v10 }
 0x2bc   : > { %731 = vpush %v509_v15  ;;  %v530_v18 = vrot.slane %v529_v14, 1 }
 0x2bd   : > { %733 = vpush %v521_v17 }
 0x2be   : > { %v531_v19 = vadd.f32 %v530_v18, %v529_v14 }
 0x2c0   : > { %735 = vpush %v531_v19 }
 0x2ed   : > { %s732_s14 = spop %731 }
 0x2ee   : > { %s734_s15 = spop %733  ;;  %v540_v23 = vstv %s732_s14 }
 0x2ef   : > { %v538_v21 = vstv %s734_s15 }
 0x2f1   : > { %s736_s17 = spop %735 }
 0x2f2   : > { %v536_v20 = vstv %s736_s17 }
 0x2f3   : > { %v537_v22 = vsel %vm535_vm9, %v536_v20, 0.0 }
 0x2f4   : > { %v539_v24 = vsel %vm534_vm10, %v538_v21, %v537_v22 }
 0x2f5   : > { %v541_v25 = vsel %vm533_vm11, %v540_v23, %v539_v24 }
 0x2f6   : > { %549 = vst [vmem:[%s313_s24] sm:$0xff] %v541_v25 }
 0x2f7   : > { %826 = shalt.err (!%p823_p5)
}
 0x2f8   : > { %s827_s12 = scalar_lea.hbm %s1035_s7, 128  ;;  %s831_s15 = scalar_lea.hbm %s1087_s5, 256 }
 0x2f9   : > { %p828_p6 = scmp.ne.s32.totalorder %s1035_s7, %s827_s12  ;;  %p832_p10 = scmp.lt.u32.totalorder %s1035_s7, %s1087_s5 }
 0x2fa   : > { %p833_p11 = scmp.lt.u32.totalorder %s831_s15, %s827_s12  ;;  %p835_p13 = scmp.lt.u32.totalorder %s827_s12, %s1035_s7 }
 0x2fb   : > { %p829_p7 = pnand %p828_p6, %p972_p4 }
 0x2fc   : > { %p834_p12 = por %p833_p11, %p832_p10 }
 0x2fd   : > { %p830_p9 = pneg %p829_p7 }
 0x2fe   : > { %p836_p0 = por %p835_p13, %p834_p12 }
 0x300   : > { %p837_p1 = pnand %p836_p0, %p830_p9 }
 0x302   : > { %840 = shalt.err (!%p837_p1)
}
 0x303   : > { %737 = dma.vmem_to_hbm [thread:$0]  (%p972_p4), %s1037_s25, 128, %s1035_s7, %s551_s21  }
 0x304 PF: > { %p743_p2 = scmp.ge.s32.totalorder %s891_s23, 2  ;;  %s576_s24 = sand.u32 1, %s871_s18  }
 0x305   : > { %s577_s27 = scalar_lea.sflag [#allocation4], %s576_s24 }
 0x306   : > { %p740_p3 = pnand %p743_p2, %p979_p8 }
 0x308   : > { %866 = dma.done.wait (!%p740_p3), %s577_s27, 128  }
 0x309   : > { %868 = vsyncadd (!%p740_p3), %s577_s27, 4294967168  ;;  %s18_s23 = sadd.s32 1, %s891_s23   ;;  %s1092_s18 = smov %s875_s19 }
 0x30a   : > { %p15_p5 = scmp.ge.s32.totalorder %s18_s23, 4   ;;  %s1093_s19 = smov %s879_s20 }
 0x30b   : > { %s1094_s20 = smov %s985_s6  ;;  %s1095_s21 = smov %s887_s22 }
 0x30c   : > { %s1096_s22 = smov %s1098_s26  ;;  %17 = sbr.rel (!%p15_p5) target bundleno = 4 (0x4), region = 95 }
 0x313   :  { %582 = vsyncpa [#allocation4], 1 }
 0x314   :  { %584 = vsyncpa [#allocation4 + $0x1], 1 }

</bundles_post_ra>
